<compile_context>
chip_gen: v6e
topology: v6e:2x2x1
jax: 0.10.0
libtpu: 0.0.40
codegen_flags: <defaults>
</compile_context>

<pallas_src>
import functools
import math

import jax
import jax.numpy as jnp
from jax.experimental import pallas as pl
from jax.experimental.pallas import tpu as pltpu

EPS = 1e-5


def _patch_embed_kernel(x_ref, w_ref, g1_ref, g2_ref, o_ref):
    """x_ref: (tm, dim_in); w_ref: (dim_in, dim_out) in the MXU operand dtype;
    g1_ref: (1, dim_in) f32; g2_ref: (1, dim_out) f32; o_ref: (tm, dim_out)."""
    x = x_ref[...].astype(jnp.float32)
    d_in = x.shape[-1]
    d_out = o_ref.shape[-1]

    # ---- LayerNorm #1 (no bias): single-pass stats E[x], E[x^2] so only one
    # (tm, dim_in) f32 temporary is live alongside x. ----
    inv_din = 1.0 / d_in
    mean1 = jnp.sum(x, axis=-1, keepdims=True) * inv_din
    var1 = jnp.maximum(
        jnp.sum(x * x, axis=-1, keepdims=True) * inv_din - mean1 * mean1, 0.0)
    xn = (x - mean1) * jax.lax.rsqrt(var1 + EPS) * g1_ref[...]

    # ---- 1x1 conv == channel matmul: low-precision operands, f32 accumulation. ----
    y = jnp.dot(xn.astype(w_ref.dtype), w_ref[...],
                preferred_element_type=jnp.float32)

    # ---- LayerNorm #2 (no bias), same single-pass form. ----
    inv_dout = 1.0 / d_out
    mean2 = jnp.sum(y, axis=-1, keepdims=True) * inv_dout
    var2 = jnp.maximum(
        jnp.sum(y * y, axis=-1, keepdims=True) * inv_dout - mean2 * mean2, 0.0)
    o_ref[...] = ((y - mean2) * jax.lax.rsqrt(var2 + EPS)
                  * g2_ref[...]).astype(o_ref.dtype)


def _vmem_capacity_bytes() -> int:
    """Trace-time VMEM capacity query with a conservative (v7x-sized) fallback."""
    try:
        cap = getattr(pltpu.get_tpu_info(), "vmem_capacity_bytes", None)
        if cap:
            return int(cap)
    except Exception:
        pass
    return 64 * 2**20


@functools.partial(
    jax.jit,
    static_argnames=("patch_size", "tile_m", "mxu_dtype", "hbm_dtype",
                     "out_layout", "out_dtype"))
def patch_embedding(x, w, gamma1, gamma2, *, patch_size, tile_m=None,
                    mxu_dtype=jnp.bfloat16, hbm_dtype=jnp.bfloat16,
                    out_layout="NCHW", out_dtype=None):
    """x: (B, C, H, W) NCHW.  w: (dim_in, dim_out) = transposed 1x1-conv weight.

    Returns NCHW (B, dim_out, H/p1, W/p2).  Perf notes: pass out_layout='NHWC' to skip
    the final transpose (a full extra HBM pass) when the consumer accepts channels-last,
    and out_dtype=jnp.bfloat16 to halve output HBM traffic when acceptable."""
    p1, p2 = (patch_size, patch_size) if isinstance(patch_size, int) else patch_size
    B, C, H, W = x.shape
    h, w_sp = H // p1, W // p2
    dim_in, dim_out = C * p1 * p2, w.shape[1]
    M = B * h * w_sp
    out_dt = jnp.dtype(out_dtype) if out_dtype is not None else x.dtype

    # Patchify rearrange 'b c (h p1) (w p2) -> (b h w) (c p1 p2)', with the bf16 cast
    # fused into the same producer so only ONE extra HBM pass is materialized.
    xt = x.astype(hbm_dtype).reshape(B, C, h, p1, w_sp, p2)
    xt = jnp.transpose(xt, (0, 2, 4, 1, 3, 5)).reshape(M, dim_in)

    wp = w.astype(mxu_dtype)                            # cast once, outside the kernel
    g1 = gamma1.reshape(1, dim_in).astype(jnp.float32)
    g2 = gamma2.reshape(1, dim_out).astype(jnp.float32)

    in_b = jnp.dtype(hbm_dtype).itemsize
    out_b = jnp.dtype(out_dt).itemsize
    mxu_b = jnp.dtype(mxu_dtype).itemsize

    # Per-generation VMEM budget: ~96 MiB on 128 MiB parts (v5e/v6e), ~48 MiB on v7x.
    vmem_limit = int(min(100 * 2**20,
                         max(32 * 2**20, (_vmem_capacity_bytes() * 3) // 4)))

    const_bytes = dim_in * dim_out * mxu_b + (dim_in + dim_out) * 4
    single_buffer_consts = const_bytes >= (2 << 20)     # only matters for big weights
    const_bufs = 1 if single_buffer_consts else 2

    if tile_m is None:
        # Per-token-row VMEM: double-buffered in/out tiles + ~2 live f32 temps per side.
        per_row = (2 * dim_in * in_b + 2 * dim_out * out_b
                   + 2 * dim_in * 4 + 2 * dim_out * 4)
        budget = int(vmem_limit * 0.7) - const_bufs * const_bytes
        tm = (max(budget, 8 * per_row) // per_row) // 8 * 8
        tm = int(max(8, min(1024, tm)))
    else:
        tm = int(max(8, (tile_m // 8) * 8))

    if M <= tm:
        tm = M                      # one full-extent block (valid for any M)
    else:
        # Keep the 1-D 'parallel' grid long enough to feed both v7x TensorCores.
        while pl.cdiv(M, tm) < 8 and tm >= 512:
            tm //= 2
        tm = max(8, (tm // 8) * 8)
    grid = (pl.cdiv(M, tm),)        # partial last block instead of row padding

    # Constant-index blocks: double-buffering buys nothing; single-buffer when big.
    const_kw = dict(pipeline_mode=pl.Buffered(1)) if single_buffer_consts else {}

    cost = pl.CostEstimate(
        flops=2 * M * dim_in * dim_out,
        transcendentals=2 * M,
        bytes_accessed=(M * dim_in * in_b + M * dim_out * out_b
                        + dim_in * dim_out * mxu_b + (dim_in + dim_out) * 4),
    )

    out = pl.pallas_call(
        _patch_embed_kernel,
        out_shape=jax.ShapeDtypeStruct((M, dim_out), out_dt),
        grid_spec=pltpu.PrefetchScalarGridSpec(
            num_scalar_prefetch=0,
            grid=grid,
            in_specs=[
                pl.BlockSpec((tm, dim_in), lambda i: (i, 0)),
                pl.BlockSpec((dim_in, dim_out), lambda i: (0, 0), **const_kw),
                pl.BlockSpec((1, dim_in), lambda i: (0, 0), **const_kw),
                pl.BlockSpec((1, dim_out), lambda i: (0, 0), **const_kw),
            ],
            out_specs=pl.BlockSpec((tm, dim_out), lambda i: (i, 0)),
        ),
        compiler_params=pltpu.CompilerParams(
            dimension_semantics=("parallel",),
            vmem_limit_bytes=vmem_limit,
        ),
        cost_estimate=cost,
    )(xt, wp, g1, g2)

    out = out.reshape(B, h, w_sp, dim_out)              # NHWC token grid, no slicing
    if out_layout == "NHWC":
        return out
    if out_layout == "NCHW":
        return jnp.transpose(out, (0, 3, 1, 2))
    raise ValueError(f"unknown out_layout: {out_layout!r}")


def _reference(x, w, gamma1, gamma2, patch_size, hbm_dtype=None, mxu_dtype=None):
    """Pure-JAX reference mirroring the PyTorch forward.  Optional hbm_dtype /
    mxu_dtype reproduce the kernel's boundary / MXU operand precision."""
    p1, p2 = patch_size
    B, C, H, W = x.shape
    h, w_sp = H // p1, W // p2
    dim_in = C * p1 * p2
    xt = x.reshape(B, C, h, p1, w_sp, p2)
    xt = jnp.transpose(xt, (0, 2, 4, 1, 3, 5)).reshape(B, h, w_sp, dim_in)
    if hbm_dtype is not None:
        xt = xt.astype(hbm_dtype)
    xt = xt.astype(jnp.float32)

    def ln(v, g):
        m = v.mean(-1, keepdims=True)
        var = ((v - m) ** 2).mean(-1, keepdims=True)
        return (v - m) * jax.lax.rsqrt(var + EPS) * g

    y = ln(xt, gamma1.astype(jnp.float32))
    if mxu_dtype is None:
        y = y @ w.astype(jnp.float32)
    else:
        y = jnp.dot(y.astype(mxu_dtype), w.astype(mxu_dtype),
                    preferred_element_type=jnp.float32)
    y = ln(y, gamma2.astype(jnp.float32))
    return jnp.transpose(y, (0, 3, 1, 2)).astype(x.dtype)


if __name__ == "__main__":
    # Small deterministic example: B=2, C=4, H=W=16, patch_size=4
    #  -> dim_in = 64, dim_out = 32, M = 32 tokens, output (2, 32, 4, 4)
    B, C, H, W = 2, 4, 16, 16
    patch_size = (4, 4)
    dim_in = C * math.prod(patch_size)
    dim_out = 32

    key = jax.random.PRNGKey(0)
    kx, kw, kg1, kg2 = jax.random.split(key, 4)
    x = jax.random.normal(kx, (B, C, H, W), dtype=jnp.float32)
    # Conv2d(dim_in, dim_out, 1, bias=False).weight is (dim_out, dim_in, 1, 1);
    # we use its (dim_in, dim_out) transpose directly.
    bound = 1.0 / math.sqrt(dim_in)
    w = jax.random.uniform(kw, (dim_in, dim_out), jnp.float32, -bound, bound)
    gamma1 = 1.0 + 0.1 * jax.random.normal(kg1, (dim_in,), jnp.float32)
    gamma2 = 1.0 + 0.1 * jax.random.normal(kg2, (dim_out,), jnp.float32)

    out = patch_embedding(x, w, gamma1, gamma2, patch_size=patch_size)
    out = jax.block_until_ready(out)
    assert out.shape == (B, dim_out, H // patch_size[0], W // patch_size[1]), out.shape

    # Tight check vs. a reference matching the kernel's precision (bf16 HBM boundary,
    # bf16 MXU operands, f32 accumulation / LN math).
    ref_match = _reference(x, w, gamma1, gamma2, patch_size,
                           hbm_dtype=jnp.bfloat16, mxu_dtype=jnp.bfloat16)
    err_m = float(jnp.max(jnp.abs(out - ref_match)))
    assert jnp.allclose(out, ref_match, atol=1e-2, rtol=1e-2), err_m

    # Looser check vs. the exact f32 module semantics (only bf16 rounding differs).
    ref_f32 = _reference(x, w, gamma1, gamma2, patch_size)
    err_f = float(jnp.max(jnp.abs(out - ref_f32)))
    assert jnp.allclose(out, ref_f32, atol=6e-2, rtol=6e-2), err_f

    # Exercise the no-row-padding partial-last-block path (M=32 with tile_m=24 ->
    # grid of 2 blocks, second one partial; OOB rows are computed then dropped).
    out_partial = patch_embedding(x, w, gamma1, gamma2, patch_size=patch_size,
                                  tile_m=24)
    assert jnp.allclose(out_partial, out, atol=1e-5, rtol=1e-5)

    # NHWC output path (skips the final NCHW transpose — recommended when possible).
    out_nhwc = patch_embedding(x, w, gamma1, gamma2, patch_size=patch_size,
                               out_layout="NHWC")
    assert jnp.allclose(jnp.transpose(out_nhwc, (0, 3, 1, 2)), out,
                        atol=1e-5, rtol=1e-5)

    print("KERNEL_OK")
</pallas_src>

<mosaic_0001>
module attributes {stable_mosaic.version = 11 : i64} {
  func.func @_patch_embed_kernel(%arg0: i32, %arg1: memref<32x64xbf16, #tpu.memory_space<vmem>>, %arg2: memref<64x32xbf16, #tpu.memory_space<vmem>>, %arg3: memref<1x64xf32, #tpu.memory_space<vmem>>, %arg4: memref<1x32xf32, #tpu.memory_space<vmem>>, %arg5: memref<32x32xf32, #tpu.memory_space<vmem>>) attributes {dimension_semantics = [#tpu.dimension_semantics<parallel>], iteration_bounds = array<i64: 1>, scalar_prefetch = 0 : i64, scratch_operands = 0 : i64, tpu.core_type = #tpu.core_type<tc>, window_params = [{transform_indices = @transform_0, window_bounds = array<i64: 32, 64>}, {pipeline_mode = #tpu.pipeline_mode<synchronous>, transform_indices = @transform_1, window_bounds = array<i64: 64, 32>}, {pipeline_mode = #tpu.pipeline_mode<synchronous>, transform_indices = @transform_2, window_bounds = array<i64: 1, 64>}, {pipeline_mode = #tpu.pipeline_mode<synchronous>, transform_indices = @transform_3, window_bounds = array<i64: 1, 32>}, {transform_indices = @transform_4, window_bounds = array<i64: 32, 32>}]} {
    %c0 = arith.constant 0 : index
    %c0_0 = arith.constant 0 : index
    %0 = vector.load %arg1[%c0, %c0_0] : memref<32x64xbf16, #tpu.memory_space<vmem>>, vector<32x64xbf16>
    %1 = arith.extf %0 : vector<32x64xbf16> to vector<32x64xf32>
    %cst = arith.constant dense<0.000000e+00> : vector<32xf32>
    %2 = vector.multi_reduction <add>, %1, %cst [1] : vector<32x64xf32> to vector<32xf32>
    %3 = vector.shape_cast %2 : vector<32xf32> to vector<32x1xf32>
    %cst_1 = arith.constant 1.562500e-02 : f32
    %4 = vector.broadcast %cst_1 : f32 to vector<32x1xf32>
    %5 = arith.mulf %3, %4 : vector<32x1xf32>
    %6 = arith.mulf %1, %1 : vector<32x64xf32>
    %cst_2 = arith.constant dense<0.000000e+00> : vector<32xf32>
    %7 = vector.multi_reduction <add>, %6, %cst_2 [1] : vector<32x64xf32> to vector<32xf32>
    %8 = vector.shape_cast %7 : vector<32xf32> to vector<32x1xf32>
    %cst_3 = arith.constant 1.562500e-02 : f32
    %9 = vector.broadcast %cst_3 : f32 to vector<32x1xf32>
    %10 = arith.mulf %8, %9 : vector<32x1xf32>
    %11 = arith.mulf %5, %5 : vector<32x1xf32>
    %12 = arith.subf %10, %11 : vector<32x1xf32>
    %cst_4 = arith.constant 0.000000e+00 : f32
    %13 = vector.broadcast %cst_4 : f32 to vector<32x1xf32>
    %14 = arith.maximumf %12, %13 : vector<32x1xf32>
    %15 = vector.broadcast %5 : vector<32x1xf32> to vector<32x64xf32>
    %16 = arith.subf %1, %15 : vector<32x64xf32>
    %cst_5 = arith.constant 9.99999974E-6 : f32
    %17 = vector.broadcast %cst_5 : f32 to vector<32x1xf32>
    %18 = arith.addf %14, %17 : vector<32x1xf32>
    %19 = math.rsqrt %18 : vector<32x1xf32>
    %20 = vector.broadcast %19 : vector<32x1xf32> to vector<32x64xf32>
    %21 = arith.mulf %16, %20 : vector<32x64xf32>
    %c0_6 = arith.constant 0 : index
    %c0_7 = arith.constant 0 : index
    %22 = vector.load %arg3[%c0_6, %c0_7] : memref<1x64xf32, #tpu.memory_space<vmem>>, vector<1x64xf32>
    %23 = vector.broadcast %22 : vector<1x64xf32> to vector<32x64xf32>
    %24 = arith.mulf %21, %23 : vector<32x64xf32>
    %25 = arith.truncf %24 : vector<32x64xf32> to vector<32x64xbf16>
    %c0_8 = arith.constant 0 : index
    %c0_9 = arith.constant 0 : index
    %26 = vector.load %arg2[%c0_8, %c0_9] : memref<64x32xbf16, #tpu.memory_space<vmem>>, vector<64x32xbf16>
    %cst_10 = arith.constant dense<0.000000e+00> : vector<32x32xf32>
    %27 = tpu.matmul %25, %26, %cst_10 {dimension_numbers = #tpu.dot_dimension_numbers<[1], [0], [0], [1], [0, 0, 1, 1], [], []>} : vector<32x64xbf16>, vector<64x32xbf16>, vector<32x32xf32> -> vector<32x32xf32>
    %cst_11 = arith.constant dense<0.000000e+00> : vector<32xf32>
    %28 = vector.multi_reduction <add>, %27, %cst_11 [1] : vector<32x32xf32> to vector<32xf32>
    %29 = vector.shape_cast %28 : vector<32xf32> to vector<32x1xf32>
    %cst_12 = arith.constant 3.125000e-02 : f32
    %30 = vector.broadcast %cst_12 : f32 to vector<32x1xf32>
    %31 = arith.mulf %29, %30 : vector<32x1xf32>
    %32 = arith.mulf %27, %27 : vector<32x32xf32>
    %cst_13 = arith.constant dense<0.000000e+00> : vector<32xf32>
    %33 = vector.multi_reduction <add>, %32, %cst_13 [1] : vector<32x32xf32> to vector<32xf32>
    %34 = vector.shape_cast %33 : vector<32xf32> to vector<32x1xf32>
    %cst_14 = arith.constant 3.125000e-02 : f32
    %35 = vector.broadcast %cst_14 : f32 to vector<32x1xf32>
    %36 = arith.mulf %34, %35 : vector<32x1xf32>
    %37 = arith.mulf %31, %31 : vector<32x1xf32>
    %38 = arith.subf %36, %37 : vector<32x1xf32>
    %cst_15 = arith.constant 0.000000e+00 : f32
    %39 = vector.broadcast %cst_15 : f32 to vector<32x1xf32>
    %40 = arith.maximumf %38, %39 : vector<32x1xf32>
    %41 = vector.broadcast %31 : vector<32x1xf32> to vector<32x32xf32>
    %42 = arith.subf %27, %41 : vector<32x32xf32>
    %cst_16 = arith.constant 9.99999974E-6 : f32
    %43 = vector.broadcast %cst_16 : f32 to vector<32x1xf32>
    %44 = arith.addf %40, %43 : vector<32x1xf32>
    %45 = math.rsqrt %44 : vector<32x1xf32>
    %46 = vector.broadcast %45 : vector<32x1xf32> to vector<32x32xf32>
    %47 = arith.mulf %42, %46 : vector<32x32xf32>
    %c0_17 = arith.constant 0 : index
    %c0_18 = arith.constant 0 : index
    %48 = vector.load %arg4[%c0_17, %c0_18] : memref<1x32xf32, #tpu.memory_space<vmem>>, vector<1x32xf32>
    %49 = vector.broadcast %48 : vector<1x32xf32> to vector<32x32xf32>
    %50 = arith.mulf %47, %49 : vector<32x32xf32>
    %c0_19 = arith.constant 0 : index
    %c0_20 = arith.constant 0 : index
    %51 = vector.load %arg5[%c0_19, %c0_20] : memref<32x32xf32, #tpu.memory_space<vmem>>, vector<32x32xf32>
    tpu.vector_store %arg5[%c0_19, %c0_20], %50 {strides = array<i32>} : memref<32x32xf32, #tpu.memory_space<vmem>>, vector<32x32xf32>,
    return
  }
  func.func @transform_0(%arg0: i32) -> (i32, i32) {
    %c0_i32 = arith.constant 0 : i32
    %c0_i32_0 = arith.constant 0 : i32
    return %arg0, %c0_i32 : i32, i32
  }
  func.func @transform_1(%arg0: i32) -> (i32, i32) {
    %c0_i32 = arith.constant 0 : i32
    %c0_i32_0 = arith.constant 0 : i32
    %c0_i32_1 = arith.constant 0 : i32
    return %c0_i32, %c0_i32_0 : i32, i32
  }
  func.func @transform_2(%arg0: i32) -> (i32, i32) {
    %c0_i32 = arith.constant 0 : i32
    %c0_i32_0 = arith.constant 0 : i32
    %c0_i32_1 = arith.constant 0 : i32
    return %c0_i32, %c0_i32_0 : i32, i32
  }
  func.func @transform_3(%arg0: i32) -> (i32, i32) {
    %c0_i32 = arith.constant 0 : i32
    %c0_i32_0 = arith.constant 0 : i32
    %c0_i32_1 = arith.constant 0 : i32
    return %c0_i32, %c0_i32_0 : i32, i32
  }
  func.func @transform_4(%arg0: i32) -> (i32, i32) {
    %c0_i32 = arith.constant 0 : i32
    %c0_i32_0 = arith.constant 0 : i32
    return %arg0, %c0_i32 : i32, i32
  }
}

</mosaic_0001>

<bundles_post_ra>
// kernel: patch_embedding.1
= control target key start
LH: loop header
LB: loop body
LE: loop exit
PB: predicated region body
PF: predicated region fallthrough
CT: control target
= control target key end

     0   :  { %vm27_vm0 = vcmask 523264   ;;  %s481_s0 = inlined_call_operand.vmem [shape: bf16[32,64], index: 0, kind: input, shape index: {}]   ;;  %s482_s1 = inlined_call_operand.vmem [shape: bf16[64,32], index: 1, kind: input, shape index: {}]   ;;  %s483_s2 = inlined_call_operand.vmem [shape: f32[1,64], index: 2, kind: input, shape index: {}]   ;;  %s484_s3 = inlined_call_operand.vmem [shape: f32[1,32], index: 3, kind: input, shape index: {}]   ;;  %s485_s4 = inlined_call_operand.hbm [shape: f32[32,32], index: 4, kind: output, shape index: {}]  }
   0x1   :  { %v304_v0 = vld [vmem:[%s481_s0 + $0x8] sm:$0xff]   ;;  %v297_v1 = vld [vmem:[%s481_s0] sm:$0xff]  }
   0x2   :  { %v402_v2 = vunpack.c.l.bf16 %v304_v0  ;;  %v404_v3 = vunpack.c.l.bf16 %v297_v1  ;;  %v406_v4 = vunpack.c.h.bf16 %v304_v0  ;;  %v408_v5 = vunpack.c.h.bf16 %v297_v1 }
   0x4   :  { %v34_v6 = vsel %vm27_vm0, %v402_v2, 0.0  ;;  %v28_v7 = vsel %vm27_vm0, %v404_v3, 0.0 }
   0x5   :  { %35 = vadd.xlane.f32.xlu1 %v34_v6  ;;  %29 = vadd.xlane.f32.xlu0 %v28_v7 }
   0x6   :  { %9 = vsyncpa [#allocation3], 0  ;;  %v37_v8 = vsel %vm27_vm0, %v406_v4, 0.0  ;;  %v31_v9 = vsel %vm27_vm0, %v408_v5, 0.0  ;;  %v45_v10 = vmul.f32 %v408_v5, %v408_v5  ;;  %v44_v11 = vmul.f32 %v404_v3, %v404_v3  ;;  %v326_v18 = vld [vmem:[%s482_s1 + $0x18] sm:$0xff]   ;;  %v327_v19 = vld [vmem:[%s482_s1 + $0x10] sm:$0xff]  }
   0x7   :  { %v47_v14 = vmul.f32 %v406_v4, %v406_v4  ;;  %v46_v15 = vmul.f32 %v402_v2, %v402_v2  ;;  %311 = vmatprep.subr.bf16.mxu0 %v326_v18  ;;  %v328_v20 = vld [vmem:[%s482_s1 + $0x8] sm:$0xff]   ;;  %v329_v21 = vld [vmem:[%s482_s1] sm:$0xff]   ;;  %vm192_vm1 = vcmask 261120   ;;  %s368_s28 = smov [#allocation2]  }
   0x8   :  { %v51_v12 = vsel %vm27_vm0, %v45_v10, 0.0  ;;  %v48_v13 = vsel %vm27_vm0, %v44_v11, 0.0  ;;  %312 = vmatpush3.bf16.msra.mxu0 %v326_v18  ;;  %v288_v57 = vld [vmem:[%s483_s2] ss:$0 sm:$0xff]  ;;  %s277_s29 = sshll.u32 %s368_s28, 4  ;;  %s278_s29 = int_to_ptr.vmem [resolvable:$true] %s277_s29 }
   0x9   :  { %38 = vadd.xlane.f32.xlu1 %v37_v8  ;;  %32 = vadd.xlane.f32.xlu0 %v31_v9  ;;  %v57_v16 = vsel %vm27_vm0, %v47_v14, 0.0  ;;  %v54_v17 = vsel %vm27_vm0, %v46_v15, 0.0  ;;  %p351_p1 = scmp.lt.s32.totalorder %s278_s29, %s278_s29 }
   0xa   :  { %313 = vmatprep.subr.bf16.mxu0 %v327_v19 }
   0xc   :  { %314 = vmatpush3.bf16.msra.mxu0 %v327_v19 }
   0xd   :  { %52 = vadd.xlane.f32.xlu1 %v51_v12  ;;  %49 = vadd.xlane.f32.xlu0 %v48_v13 }
   0xe   :  { %315 = vmatprep.subr.bf16.mxu0 %v328_v20 }
  0x10   :  { %316 = vmatpush3.bf16.msra.mxu0 %v328_v20 }
  0x11   :  { %58 = vadd.xlane.f32.xlu1 %v57_v16  ;;  %55 = vadd.xlane.f32.xlu0 %v54_v17 }
  0x12   :  { %317 = vmatprep.subr.bf16.mxu0 %v329_v21 }
  0x14   :  { %318 = vmatpush3.bf16.msra.mxu0 %v329_v21 }
  0x8e   :  { %v36_v22 = vpop.xlane.xlu1 %35  ;;  %v30_v23 = vpop.xlane.xlu0 %29 }
  0x8f   :  { %v40_v26 = vmul.f32 0.015625, %v30_v23  ;;  %v42_v28 = vmul.f32 0.015625, %v36_v22 }
  0x91   :  { %v64_v32 = vmul.f32 %v40_v26, %v40_v26  ;;  %v66_v38 = vmul.f32 %v42_v28, %v42_v28  ;;  %v76_v56 = vsub.f32 %v404_v3, %v40_v26  ;;  %v78_v0 = vsub.f32 %v402_v2, %v42_v28 }
  0x92   :  { %v39_v24 = vpop.xlane.xlu1 %38  ;;  %v33_v25 = vpop.xlane.xlu0 %32 }
  0x93   :  { %v41_v27 = vmul.f32 0.015625, %v33_v25  ;;  %v43_v29 = vmul.f32 0.015625, %v39_v24 }
  0x95   :  { %v65_v33 = vmul.f32 %v41_v27, %v41_v27  ;;  %v67_v39 = vmul.f32 %v43_v29, %v43_v29  ;;  %v77_v54 = vsub.f32 %v408_v5, %v41_v27  ;;  %v79_v61 = vsub.f32 %v406_v4, %v43_v29 }
  0x96   :  { %v53_v30 = vpop.xlane.xlu1 %52  ;;  %v50_v31 = vpop.xlane.xlu0 %49 }
  0x97   :  { %v61_v34 = vmul.f32 0.015625, %v53_v30  ;;  %v60_v35 = vmul.f32 0.015625, %v50_v31 }
  0x99   :  { %v69_v36 = vsub.f32 %v61_v34, %v65_v33  ;;  %v68_v37 = vsub.f32 %v60_v35, %v64_v32 }
  0x9a   :  { %v59_v40 = vpop.xlane.xlu1 %58  ;;  %v56_v41 = vpop.xlane.xlu0 %55 }
  0x9b   :  { %v73_v42 = vmax.f32 %v69_v36, 0.0  ;;  %v72_v43 = vmax.f32 %v68_v37, 0.0  ;;  %v63_v44 = vmul.f32 0.015625, %v59_v40  ;;  %v62_v45 = vmul.f32 0.015625, %v56_v41 }
  0x9d   :  { %v81_v46 = vadd.f32 1e-05, %v73_v42  ;;  %v80_v47 = vadd.f32 1e-05, %v72_v43  ;;  %v71_v48 = vsub.f32 %v63_v44, %v67_v39  ;;  %v70_v49 = vsub.f32 %v62_v45, %v66_v38 }
  0x9f   :  { %330 = vrsqrt.f32 %v81_v46  ;;  %v75_v50 = vmax.f32 %v71_v48, 0.0  ;;  %v74_v51 = vmax.f32 %v70_v49, 0.0 }
  0xa0   :  { %332 = vrsqrt.f32 %v80_v47 }
  0xa1   :  { %v83_v52 = vadd.f32 1e-05, %v75_v50  ;;  %v82_v53 = vadd.f32 1e-05, %v74_v51 }
  0xa3   :  { %334 = vrsqrt.f32 %v83_v52 }
  0xa4   :  { %336 = vrsqrt.f32 %v82_v53 }
  0xac   :  { %v331_v55 = vpop.eup %330 }
  0xad   :  { %v333_v58 = vpop.eup %332  ;;  %v89_v59 = vmul.f32 %v331_v55, %v77_v54 }
  0xae   :  { %v88_v60 = vmul.f32 %v333_v58, %v76_v56 }
  0xaf   :  { %v100_v62 = vmul.f32 %v288_v57, %v89_v59  ;;  %v295_v59 = vld [vmem:[%s484_s3] ss:$0 sm:$0xff]  ;;  %s346_s3 = scalar_lea.vmem %s278_s29, 512 }
  0xb0   :  { %v335_v63 = vpop.eup %334  ;;  %v99_v1 = vmul.f32 %v288_v57, %v88_v60  ;;  %p347_p0 = scmp.ne.s32.totalorder %s278_s29, %s346_s3  ;;  %p352_p2 = scmp.lt.s32.totalorder %s346_s3, %s346_s3 }
  0xb1   :  { %v337_v6 = vpop.eup %336  ;;  %v91_v7 = vmul.f32 %v335_v63, %v79_v61 }
  0xb2   :  { %v103_v5 = vpack.c.bf16 %v100_v62, %v99_v1  ;;  %v90_v8 = vmul.f32 %v337_v6, %v78_v0  ;;  %p353_p3 = por %p352_p2, %p351_p1 }
  0xb3   :  { %v102_v9 = vmul.f32 %v288_v57, %v91_v7 }
  0xb4   :  { %319 = vmatprep.mubr.msk.bf16.mxu0 %vm27_vm0, %v103_v5  ;;  %v101_v3 = vmul.f32 %v288_v57, %v90_v8  ;;  %p354_p4 = pnand %p353_p3, %p347_p0 }
  0xb6   :  { %v104_v10 = vpack.c.bf16 %v102_v9, %v101_v3 }
  0xb8   :  { %320 = vmatmul.mubr.msk.bf16.vlgmr.msra.gmra.mxu0 %vm27_vm0, %v104_v10 }
 0x178   :  { %v451_v11 = vpop.f32.mrf.mxu0 }
 0x179   :  { %v199_v4 = vsel %vm192_vm1, %v451_v11, 0.0  ;;  %v211_v20 = vmul.f32 %v451_v11, %v451_v11 }
 0x17a   :  { %200 = vadd.xlane.f32.xlu0 %v199_v4  ;;  %v177_v2 = vpop.f32.mrf.mxu0 }
 0x17b   :  { %v193_v13 = vsel %vm192_vm1, %v177_v2, 0.0  ;;  %v209_v15 = vmul.f32 %v177_v2, %v177_v2  ;;  %v219_v21 = vsel %vm192_vm1, %v211_v20, 0.0 }
 0x17c   :  { %v455_v12 = vpop.f32.mrf.mxu0 }
 0x17d   :  { %v202_v14 = vsel %vm192_vm1, %v455_v12, 0.0  ;;  %v213_v18 = vsel %vm192_vm1, %v209_v15, 0.0  ;;  %v212_v23 = vmul.f32 %v455_v12, %v455_v12 }
 0x17e   :  { %194 = vadd.xlane.f32.xlu0 %v193_v13  ;;  %203 = vadd.xlane.f32.xlu1 %v202_v14  ;;  %v180_v16 = vpop.f32.mrf.mxu0 }
 0x17f   :  { %v210_v17 = vmul.f32 %v180_v16, %v180_v16  ;;  %v196_v19 = vsel %vm192_vm1, %v180_v16, 0.0  ;;  %v222_v24 = vsel %vm192_vm1, %v212_v23, 0.0 }
 0x181   :  { %v216_v22 = vsel %vm192_vm1, %v210_v17, 0.0 }
 0x182   :  { %214 = vadd.xlane.f32.xlu0 %v213_v18  ;;  %197 = vadd.xlane.f32.xlu1 %v196_v19 }
 0x186   :  { %220 = vadd.xlane.f32.xlu0 %v219_v21  ;;  %217 = vadd.xlane.f32.xlu1 %v216_v22 }
 0x18a   :  { %223 = vadd.xlane.f32.xlu1 %v222_v24 }
 0x203   :  { %v201_v25 = vpop.xlane.xlu0 %200 }
 0x204   :  { %v207_v29 = vmul.f32 0.03125, %v201_v25 }
 0x206   :  { %v231_v36 = vmul.f32 %v207_v29, %v207_v29  ;;  %v243_v61 = vsub.f32 %v451_v11, %v207_v29 }
 0x207   :  { %v195_v26 = vpop.xlane.xlu0 %194  ;;  %v204_v27 = vpop.xlane.xlu1 %203 }
 0x208   :  { %v205_v28 = vmul.f32 0.03125, %v195_v26  ;;  %v208_v37 = vmul.f32 0.03125, %v204_v27 }
 0x20a   :  { %v229_v32 = vmul.f32 %v205_v28, %v205_v28  ;;  %v232_v47 = vmul.f32 %v208_v37, %v208_v37  ;;  %v241_v57 = vsub.f32 %v177_v2, %v205_v28  ;;  %v244_v5 = vsub.f32 %v455_v12, %v208_v37 }
 0x20b   :  { %v215_v30 = vpop.xlane.xlu0 %214  ;;  %v198_v31 = vpop.xlane.xlu1 %197 }
 0x20c   :  { %v225_v33 = vmul.f32 0.03125, %v215_v30  ;;  %v206_v34 = vmul.f32 0.03125, %v198_v31 }
 0x20e   :  { %v233_v35 = vsub.f32 %v225_v33, %v229_v32  ;;  %v230_v41 = vmul.f32 %v206_v34, %v206_v34  ;;  %v242_v0 = vsub.f32 %v180_v16, %v206_v34 }
 0x20f   :  { %v221_v38 = vpop.xlane.xlu0 %220  ;;  %v218_v39 = vpop.xlane.xlu1 %217 }
 0x210   :  { %v237_v40 = vmax.f32 %v233_v35, 0.0  ;;  %v227_v42 = vmul.f32 0.03125, %v221_v38  ;;  %v226_v43 = vmul.f32 0.03125, %v218_v39 }
 0x212   :  { %v245_v44 = vadd.f32 1e-05, %v237_v40  ;;  %v235_v45 = vsub.f32 %v227_v42, %v231_v36  ;;  %v234_v46 = vsub.f32 %v226_v43, %v230_v41 }
 0x213   :  { %v224_v48 = vpop.xlane.xlu1 %223 }
 0x214   :  { %338 = vrsqrt.f32 %v245_v44  ;;  %v239_v49 = vmax.f32 %v235_v45, 0.0  ;;  %v238_v50 = vmax.f32 %v234_v46, 0.0  ;;  %v228_v51 = vmul.f32 0.03125, %v224_v48 }
 0x216   :  { %v247_v52 = vadd.f32 1e-05, %v239_v49  ;;  %v246_v53 = vadd.f32 1e-05, %v238_v50  ;;  %v236_v54 = vsub.f32 %v228_v51, %v232_v47 }
 0x218   :  { %340 = vrsqrt.f32 %v247_v52  ;;  %v240_v55 = vmax.f32 %v236_v54, 0.0 }
 0x219   :  { %342 = vrsqrt.f32 %v246_v53 }
 0x21a   :  { %v248_v56 = vadd.f32 1e-05, %v240_v55 }
 0x21c   :  { %344 = vrsqrt.f32 %v248_v56 }
 0x221   :  { %v339_v58 = vpop.eup %338 }
 0x222   :  { %v253_v60 = vmul.f32 %v339_v58, %v241_v57 }
 0x224   :  { %v264_v62 = vmul.f32 %v295_v59, %v253_v60 }
 0x225   :  { %v341_v63 = vpop.eup %340 }
 0x226   :  { %v343_v1 = vpop.eup %342  ;;  %v255_v6 = vmul.f32 %v341_v63, %v243_v61  ;;  %268 = vst.msk [vmem:[#allocation2] sm:$0xff] %vm192_vm1, %v264_v62 }
 0x227   :  { %v254_v7 = vmul.f32 %v343_v1, %v242_v0 }
 0x228   :  { %v266_v8 = vmul.f32 %v295_v59, %v255_v6 }
 0x229   :  { %v345_v9 = vpop.eup %344  ;;  %v265_v3 = vmul.f32 %v295_v59, %v254_v7 }
 0x22a   :  { %v256_v10 = vmul.f32 %v345_v9, %v244_v5  ;;  %270 = vst.msk [vmem:[#allocation2 + $0x10] sm:$0xff] %vm192_vm1, %v266_v8 }
 0x22b   :  { %269 = vst.msk [vmem:[#allocation2 + $0x8] sm:$0xff] %vm192_vm1, %v265_v3 }
 0x22c   :  { %v267_v11 = vmul.f32 %v295_v59, %v256_v10 }
 0x22e   :  { %271 = vst.msk [vmem:[#allocation2 + $0x18] sm:$0xff] %vm192_vm1, %v267_v11 }
 0x22f   :  { %357 = shalt.err (!%p354_p4)
}
 0x230   :  { %s369_s30 = smov 128   ;;  %s370_s5 = smov 8  }
 0x231   :  { %283 = dma.vmem_to_hbm [thread:$0]  %s278_s29, 512, %s485_s4, [#allocation3], %s369_s30, %s369_s30, %s370_s5  }
 0x232   :  { %366 = dma.done.wait [#allocation3], 512  }
 0x233   :  { %367 = vsyncadd [#allocation3], 4294966784 }
 0x234   :  { %287 = vsyncpa [#allocation3], 1 }

</bundles_post_ra>
